<compile_context>
chip_gen: v7x
topology: tpu7x:2x2x1
jax: 0.10.0
libtpu: 0.0.40
codegen_flags: <defaults>
</compile_context>

<pallas_src>
import jax
import jax.numpy as jnp
from jax.experimental import pallas as pl
from jax.experimental.pallas import tpu as pltpu


def _make_kernel(nx: int, ny: int):
    """Build a kernel closed over the static breakpoint counts."""
    n_cx = nx - 1
    n_cy = ny - 1

    def kernel(pts_ref, coef_ref, x_ref, y_ref, o_ref):
        # pts: SMEM f32[nx+ny] (x breakpoints then y breakpoints)
        # coef: SMEM f32[n_cx*n_cy*4] -> (a', b', c', d') per cell, 1/(dx*dy) pre-folded
        # x / y / o: VMEM f32[TR, LANES]
        x = x_ref[...]
        y = y_ref[...]

        # Telescoped relu "hat" factors, shared across adjacent cells.
        # 1/dx and 1/dy are folded into the coefficients, so only raw differences here.
        ry = [jnp.maximum(y - pts_ref[nx + j], 0.0) for j in range(ny)]
        cy = [ry[j] - ry[j + 1] for j in range(n_cy)]
        rx = [jnp.maximum(x - pts_ref[i], 0.0) for i in range(nx)]

        acc = None
        # nx, ny are small & static -> fully unrolled straight-line chain.
        for i in range(n_cx):
            cx = rx[i] - rx[i + 1]
            inner = None
            for j in range(n_cy):
                base = 4 * (i * n_cy + j)
                a = coef_ref[base + 0]
                b = coef_ref[base + 1]
                c = coef_ref[base + 2]
                d = coef_ref[base + 3]
                # Horner form: (a + c*y) + x*(b + d*y)  -- no x*y temp needed.
                bilinear = (a + c * y) + x * (b + d * y)
                term = cy[j] * bilinear
                inner = term if inner is None else inner + term
            contrib = cx * inner
            acc = contrib if acc is None else acc + contrib

        o_ref[...] = acc

    return kernel


def relu_segment_network_2d(x, y, x_points, y_points, z_grid, *, tile_rows=256):
    """Piecewise-bilinear forward pass via a Pallas TPU kernel.

    x, y: same-shape float32 arrays (elementwise op).
    x_points (nx,), y_points (ny,): strictly increasing breakpoints.
    z_grid (nx, ny): grid values.
    """
    x = jnp.asarray(x, jnp.float32)
    y = jnp.asarray(y, jnp.float32)
    assert x.shape == y.shape, "elementwise op: x and y must share a shape"
    xp = jnp.asarray(x_points, jnp.float32)
    yp = jnp.asarray(y_points, jnp.float32)
    zg = jnp.asarray(z_grid, jnp.float32)
    nx = int(xp.shape[0])
    ny = int(yp.shape[0])
    n_cx, n_cy = nx - 1, ny - 1

    orig_shape = x.shape
    total = int(x.size)
    if total == 0 or n_cx <= 0 or n_cy <= 0:
        # No cells (or no data): the reference sum is identically zero.
        return jnp.zeros(orig_shape, jnp.float32)

    # --- per-cell scalar coefficients (plain JAX, live in SMEM) with 1/(dx*dy) folded in ---
    dx = xp[1:] - xp[:-1]                       # (nx-1,)
    dy = yp[1:] - yp[:-1]                       # (ny-1,)
    scale = 1.0 / (dx[:, None] * dy[None, :])   # idx_i * idy_j
    z00 = zg[:-1, :-1]
    z10 = zg[1:, :-1]
    z01 = zg[:-1, 1:]
    z11 = zg[1:, 1:]
    a = z00 * scale
    b = ((z10 - z00) / dx[:, None]) * scale
    c = ((z01 - z00) / dy[None, :]) * scale
    d = ((z11 - z10 - z01 + z00) * scale) * scale
    coef = jnp.stack([a, b, c, d], axis=-1).reshape(-1)   # (n_cx*n_cy*4,)
    pts = jnp.concatenate([xp, yp])                        # (nx+ny,)

    # --- flatten to a lane-dense 2D slab (lanes capped at 512; ~0.5 MiB blocks) ---
    lanes = 128
    for cand in (512, 256):
        if total % cand == 0 and total // cand >= 8:
            lanes = cand
            break
    rows = -(-total // lanes)                   # ceil

    # Tile rows: multiple of 8, <= tile_rows, aiming for >=8 grid steps when the
    # input is big enough (lets the "parallel" axis shard across v7x's 2 TCs).
    tr = -(-rows // 8)                          # rows per step if we had 8 steps
    tr = -(-tr // 8) * 8                        # round up to a multiple of 8
    tr = max(8, min(tile_rows, tr))
    rows_padded = -(-rows // tr) * tr
    pad = rows_padded * lanes - total

    xf = x.reshape(-1)
    yf = y.reshape(-1)
    if pad:
        xf = jnp.pad(xf, (0, pad))
        yf = jnp.pad(yf, (0, pad))
    xf = xf.reshape(rows_padded, lanes)
    yf = yf.reshape(rows_padded, lanes)

    kernel = _make_kernel(nx, ny)

    smem_spec = pl.BlockSpec(memory_space=pltpu.SMEM)
    vmem_spec = pl.BlockSpec((tr, lanes), lambda i: (i, 0))

    out2d = pl.pallas_call(
        kernel,
        out_shape=jax.ShapeDtypeStruct((rows_padded, lanes), jnp.float32),
        grid=(rows_padded // tr,),
        in_specs=[smem_spec, smem_spec, vmem_spec, vmem_spec],
        out_specs=vmem_spec,
        compiler_params=pltpu.CompilerParams(
            dimension_semantics=("parallel",),
            vmem_limit_bytes=32 * 1024 * 1024),
    )(pts, coef, xf, yf)

    if pad:
        return out2d.reshape(-1)[:total].reshape(orig_shape)
    return out2d.reshape(orig_shape)


def _reference(x, y, x_points, y_points, z_grid):
    """Pure-JAX reference mirroring the PyTorch forward exactly."""
    x = jnp.asarray(x, jnp.float32)
    y = jnp.asarray(y, jnp.float32)
    xp = jnp.asarray(x_points, jnp.float32)
    yp = jnp.asarray(y_points, jnp.float32)
    zg = jnp.asarray(z_grid, jnp.float32)
    result = jnp.zeros_like(x)
    for i in range(xp.shape[0] - 1):
        for j in range(yp.shape[0] - 1):
            x0, x1 = xp[i], xp[i + 1]
            y0, y1 = yp[j], yp[j + 1]
            char_x = (jax.nn.relu(x - x0) - jax.nn.relu(x - x1)) / (x1 - x0)
            char_y = (jax.nn.relu(y - y0) - jax.nn.relu(y - y1)) / (y1 - y0)
            char_func = char_x * char_y
            z00 = zg[i, j]
            z10 = zg[i + 1, j]
            z01 = zg[i, j + 1]
            z11 = zg[i + 1, j + 1]
            dx = x1 - x0
            dy = y1 - y0
            a = z00
            b = (z10 - z00) / dx
            c = (z01 - z00) / dy
            d = (z11 - z10 - z01 + z00) / (dx * dy)
            bilinear = a + b * x + c * y + d * x * y
            result = result + bilinear * char_func
    return result


if __name__ == "__main__":
    # Deterministic "parameters" (breakpoints and grid values).
    x_points = jnp.array([-2.0, -1.0, 0.0, 1.0, 2.0], dtype=jnp.float32)
    y_points = jnp.array([-2.0, -1.0, 0.0, 1.0, 2.0], dtype=jnp.float32)
    ii = jnp.arange(5, dtype=jnp.float32)
    z_grid = jnp.sin(ii[:, None]) + 0.5 * jnp.cos(ii[None, :])   # (5, 5)

    # Deterministic example inputs, NCHW-like small shape.
    key = jax.random.PRNGKey(0)
    kx, ky = jax.random.split(key)
    x = 2.0 * jax.random.normal(kx, (2, 4, 16, 16), dtype=jnp.float32)
    y = 2.0 * jax.random.normal(ky, (2, 4, 16, 16), dtype=jnp.float32)

    out = relu_segment_network_2d(x, y, x_points, y_points, z_grid)
    out = jax.block_until_ready(out)

    ref = _reference(x, y, x_points, y_points, z_grid)
    assert out.shape == x.shape and out.dtype == jnp.float32
    assert jnp.allclose(out, ref, atol=1e-3, rtol=1e-4)
    print("KERNEL_OK")
</pallas_src>

<mosaic_0001>
module attributes {stable_mosaic.version = 11 : i64} {
  func.func @kernel(%arg0: i32, %arg1: memref<10xf32, #tpu.memory_space<smem>>, %arg2: memref<64xf32, #tpu.memory_space<smem>>, %arg3: memref<8x256xf32, #tpu.memory_space<vmem>>, %arg4: memref<8x256xf32, #tpu.memory_space<vmem>>, %arg5: memref<8x256xf32, #tpu.memory_space<vmem>>) attributes {dimension_semantics = [#tpu.dimension_semantics<parallel>], iteration_bounds = array<i64: 1>, scalar_prefetch = 0 : i64, scratch_operands = 0 : i64, tpu.core_type = #tpu.core_type<tc>, window_params = [{transform_indices = @transform_0, window_bounds = array<i64: 10>}, {transform_indices = @transform_1, window_bounds = array<i64: 64>}, {transform_indices = @transform_2, window_bounds = array<i64: 8, 256>}, {transform_indices = @transform_3, window_bounds = array<i64: 8, 256>}, {transform_indices = @transform_4, window_bounds = array<i64: 8, 256>}]} {
    %c0 = arith.constant 0 : index
    %c0_0 = arith.constant 0 : index
    %0 = vector.load %arg3[%c0, %c0_0] : memref<8x256xf32, #tpu.memory_space<vmem>>, vector<8x256xf32>
    %c0_1 = arith.constant 0 : index
    %c0_2 = arith.constant 0 : index
    %1 = vector.load %arg4[%c0_1, %c0_2] : memref<8x256xf32, #tpu.memory_space<vmem>>, vector<8x256xf32>
    %c5 = arith.constant 5 : index
    %2 = memref.load %arg1[%c5] : memref<10xf32, #tpu.memory_space<smem>>
    %3 = vector.broadcast %2 : f32 to vector<8x256xf32>
    %4 = arith.subf %1, %3 : vector<8x256xf32>
    %cst = arith.constant 0.000000e+00 : f32
    %5 = vector.broadcast %cst : f32 to vector<8x256xf32>
    %6 = arith.maximumf %4, %5 : vector<8x256xf32>
    %c6 = arith.constant 6 : index
    %7 = memref.load %arg1[%c6] : memref<10xf32, #tpu.memory_space<smem>>
    %8 = vector.broadcast %7 : f32 to vector<8x256xf32>
    %9 = arith.subf %1, %8 : vector<8x256xf32>
    %cst_3 = arith.constant 0.000000e+00 : f32
    %10 = vector.broadcast %cst_3 : f32 to vector<8x256xf32>
    %11 = arith.maximumf %9, %10 : vector<8x256xf32>
    %c7 = arith.constant 7 : index
    %12 = memref.load %arg1[%c7] : memref<10xf32, #tpu.memory_space<smem>>
    %13 = vector.broadcast %12 : f32 to vector<8x256xf32>
    %14 = arith.subf %1, %13 : vector<8x256xf32>
    %cst_4 = arith.constant 0.000000e+00 : f32
    %15 = vector.broadcast %cst_4 : f32 to vector<8x256xf32>
    %16 = arith.maximumf %14, %15 : vector<8x256xf32>
    %c8 = arith.constant 8 : index
    %17 = memref.load %arg1[%c8] : memref<10xf32, #tpu.memory_space<smem>>
    %18 = vector.broadcast %17 : f32 to vector<8x256xf32>
    %19 = arith.subf %1, %18 : vector<8x256xf32>
    %cst_5 = arith.constant 0.000000e+00 : f32
    %20 = vector.broadcast %cst_5 : f32 to vector<8x256xf32>
    %21 = arith.maximumf %19, %20 : vector<8x256xf32>
    %c9 = arith.constant 9 : index
    %22 = memref.load %arg1[%c9] : memref<10xf32, #tpu.memory_space<smem>>
    %23 = vector.broadcast %22 : f32 to vector<8x256xf32>
    %24 = arith.subf %1, %23 : vector<8x256xf32>
    %cst_6 = arith.constant 0.000000e+00 : f32
    %25 = vector.broadcast %cst_6 : f32 to vector<8x256xf32>
    %26 = arith.maximumf %24, %25 : vector<8x256xf32>
    %27 = arith.subf %6, %11 : vector<8x256xf32>
    %28 = arith.subf %11, %16 : vector<8x256xf32>
    %29 = arith.subf %16, %21 : vector<8x256xf32>
    %30 = arith.subf %21, %26 : vector<8x256xf32>
    %c0_7 = arith.constant 0 : index
    %31 = memref.load %arg1[%c0_7] : memref<10xf32, #tpu.memory_space<smem>>
    %32 = vector.broadcast %31 : f32 to vector<8x256xf32>
    %33 = arith.subf %0, %32 : vector<8x256xf32>
    %cst_8 = arith.constant 0.000000e+00 : f32
    %34 = vector.broadcast %cst_8 : f32 to vector<8x256xf32>
    %35 = arith.maximumf %33, %34 : vector<8x256xf32>
    %c1 = arith.constant 1 : index
    %36 = memref.load %arg1[%c1] : memref<10xf32, #tpu.memory_space<smem>>
    %37 = vector.broadcast %36 : f32 to vector<8x256xf32>
    %38 = arith.subf %0, %37 : vector<8x256xf32>
    %cst_9 = arith.constant 0.000000e+00 : f32
    %39 = vector.broadcast %cst_9 : f32 to vector<8x256xf32>
    %40 = arith.maximumf %38, %39 : vector<8x256xf32>
    %c2 = arith.constant 2 : index
    %41 = memref.load %arg1[%c2] : memref<10xf32, #tpu.memory_space<smem>>
    %42 = vector.broadcast %41 : f32 to vector<8x256xf32>
    %43 = arith.subf %0, %42 : vector<8x256xf32>
    %cst_10 = arith.constant 0.000000e+00 : f32
    %44 = vector.broadcast %cst_10 : f32 to vector<8x256xf32>
    %45 = arith.maximumf %43, %44 : vector<8x256xf32>
    %c3 = arith.constant 3 : index
    %46 = memref.load %arg1[%c3] : memref<10xf32, #tpu.memory_space<smem>>
    %47 = vector.broadcast %46 : f32 to vector<8x256xf32>
    %48 = arith.subf %0, %47 : vector<8x256xf32>
    %cst_11 = arith.constant 0.000000e+00 : f32
    %49 = vector.broadcast %cst_11 : f32 to vector<8x256xf32>
    %50 = arith.maximumf %48, %49 : vector<8x256xf32>
    %c4 = arith.constant 4 : index
    %51 = memref.load %arg1[%c4] : memref<10xf32, #tpu.memory_space<smem>>
    %52 = vector.broadcast %51 : f32 to vector<8x256xf32>
    %53 = arith.subf %0, %52 : vector<8x256xf32>
    %cst_12 = arith.constant 0.000000e+00 : f32
    %54 = vector.broadcast %cst_12 : f32 to vector<8x256xf32>
    %55 = arith.maximumf %53, %54 : vector<8x256xf32>
    %56 = arith.subf %35, %40 : vector<8x256xf32>
    %c0_13 = arith.constant 0 : index
    %57 = memref.load %arg2[%c0_13] : memref<64xf32, #tpu.memory_space<smem>>
    %c1_14 = arith.constant 1 : index
    %58 = memref.load %arg2[%c1_14] : memref<64xf32, #tpu.memory_space<smem>>
    %c2_15 = arith.constant 2 : index
    %59 = memref.load %arg2[%c2_15] : memref<64xf32, #tpu.memory_space<smem>>
    %c3_16 = arith.constant 3 : index
    %60 = memref.load %arg2[%c3_16] : memref<64xf32, #tpu.memory_space<smem>>
    %61 = vector.broadcast %59 : f32 to vector<8x256xf32>
    %62 = arith.mulf %61, %1 : vector<8x256xf32>
    %63 = vector.broadcast %57 : f32 to vector<8x256xf32>
    %64 = arith.addf %63, %62 : vector<8x256xf32>
    %65 = vector.broadcast %60 : f32 to vector<8x256xf32>
    %66 = arith.mulf %65, %1 : vector<8x256xf32>
    %67 = vector.broadcast %58 : f32 to vector<8x256xf32>
    %68 = arith.addf %67, %66 : vector<8x256xf32>
    %69 = arith.mulf %0, %68 : vector<8x256xf32>
    %70 = arith.addf %64, %69 : vector<8x256xf32>
    %71 = arith.mulf %27, %70 : vector<8x256xf32>
    %c4_17 = arith.constant 4 : index
    %72 = memref.load %arg2[%c4_17] : memref<64xf32, #tpu.memory_space<smem>>
    %c5_18 = arith.constant 5 : index
    %73 = memref.load %arg2[%c5_18] : memref<64xf32, #tpu.memory_space<smem>>
    %c6_19 = arith.constant 6 : index
    %74 = memref.load %arg2[%c6_19] : memref<64xf32, #tpu.memory_space<smem>>
    %c7_20 = arith.constant 7 : index
    %75 = memref.load %arg2[%c7_20] : memref<64xf32, #tpu.memory_space<smem>>
    %76 = vector.broadcast %74 : f32 to vector<8x256xf32>
    %77 = arith.mulf %76, %1 : vector<8x256xf32>
    %78 = vector.broadcast %72 : f32 to vector<8x256xf32>
    %79 = arith.addf %78, %77 : vector<8x256xf32>
    %80 = vector.broadcast %75 : f32 to vector<8x256xf32>
    %81 = arith.mulf %80, %1 : vector<8x256xf32>
    %82 = vector.broadcast %73 : f32 to vector<8x256xf32>
    %83 = arith.addf %82, %81 : vector<8x256xf32>
    %84 = arith.mulf %0, %83 : vector<8x256xf32>
    %85 = arith.addf %79, %84 : vector<8x256xf32>
    %86 = arith.mulf %28, %85 : vector<8x256xf32>
    %87 = arith.addf %71, %86 : vector<8x256xf32>
    %c8_21 = arith.constant 8 : index
    %88 = memref.load %arg2[%c8_21] : memref<64xf32, #tpu.memory_space<smem>>
    %c9_22 = arith.constant 9 : index
    %89 = memref.load %arg2[%c9_22] : memref<64xf32, #tpu.memory_space<smem>>
    %c10 = arith.constant 10 : index
    %90 = memref.load %arg2[%c10] : memref<64xf32, #tpu.memory_space<smem>>
    %c11 = arith.constant 11 : index
    %91 = memref.load %arg2[%c11] : memref<64xf32, #tpu.memory_space<smem>>
    %92 = vector.broadcast %90 : f32 to vector<8x256xf32>
    %93 = arith.mulf %92, %1 : vector<8x256xf32>
    %94 = vector.broadcast %88 : f32 to vector<8x256xf32>
    %95 = arith.addf %94, %93 : vector<8x256xf32>
    %96 = vector.broadcast %91 : f32 to vector<8x256xf32>
    %97 = arith.mulf %96, %1 : vector<8x256xf32>
    %98 = vector.broadcast %89 : f32 to vector<8x256xf32>
    %99 = arith.addf %98, %97 : vector<8x256xf32>
    %100 = arith.mulf %0, %99 : vector<8x256xf32>
    %101 = arith.addf %95, %100 : vector<8x256xf32>
    %102 = arith.mulf %29, %101 : vector<8x256xf32>
    %103 = arith.addf %87, %102 : vector<8x256xf32>
    %c12 = arith.constant 12 : index
    %104 = memref.load %arg2[%c12] : memref<64xf32, #tpu.memory_space<smem>>
    %c13 = arith.constant 13 : index
    %105 = memref.load %arg2[%c13] : memref<64xf32, #tpu.memory_space<smem>>
    %c14 = arith.constant 14 : index
    %106 = memref.load %arg2[%c14] : memref<64xf32, #tpu.memory_space<smem>>
    %c15 = arith.constant 15 : index
    %107 = memref.load %arg2[%c15] : memref<64xf32, #tpu.memory_space<smem>>
    %108 = vector.broadcast %106 : f32 to vector<8x256xf32>
    %109 = arith.mulf %108, %1 : vector<8x256xf32>
    %110 = vector.broadcast %104 : f32 to vector<8x256xf32>
    %111 = arith.addf %110, %109 : vector<8x256xf32>
    %112 = vector.broadcast %107 : f32 to vector<8x256xf32>
    %113 = arith.mulf %112, %1 : vector<8x256xf32>
    %114 = vector.broadcast %105 : f32 to vector<8x256xf32>
    %115 = arith.addf %114, %113 : vector<8x256xf32>
    %116 = arith.mulf %0, %115 : vector<8x256xf32>
    %117 = arith.addf %111, %116 : vector<8x256xf32>
    %118 = arith.mulf %30, %117 : vector<8x256xf32>
    %119 = arith.addf %103, %118 : vector<8x256xf32>
    %120 = arith.mulf %56, %119 : vector<8x256xf32>
    %121 = arith.subf %40, %45 : vector<8x256xf32>
    %c16 = arith.constant 16 : index
    %122 = memref.load %arg2[%c16] : memref<64xf32, #tpu.memory_space<smem>>
    %c17 = arith.constant 17 : index
    %123 = memref.load %arg2[%c17] : memref<64xf32, #tpu.memory_space<smem>>
    %c18 = arith.constant 18 : index
    %124 = memref.load %arg2[%c18] : memref<64xf32, #tpu.memory_space<smem>>
    %c19 = arith.constant 19 : index
    %125 = memref.load %arg2[%c19] : memref<64xf32, #tpu.memory_space<smem>>
    %126 = vector.broadcast %124 : f32 to vector<8x256xf32>
    %127 = arith.mulf %126, %1 : vector<8x256xf32>
    %128 = vector.broadcast %122 : f32 to vector<8x256xf32>
    %129 = arith.addf %128, %127 : vector<8x256xf32>
    %130 = vector.broadcast %125 : f32 to vector<8x256xf32>
    %131 = arith.mulf %130, %1 : vector<8x256xf32>
    %132 = vector.broadcast %123 : f32 to vector<8x256xf32>
    %133 = arith.addf %132, %131 : vector<8x256xf32>
    %134 = arith.mulf %0, %133 : vector<8x256xf32>
    %135 = arith.addf %129, %134 : vector<8x256xf32>
    %136 = arith.mulf %27, %135 : vector<8x256xf32>
    %c20 = arith.constant 20 : index
    %137 = memref.load %arg2[%c20] : memref<64xf32, #tpu.memory_space<smem>>
    %c21 = arith.constant 21 : index
    %138 = memref.load %arg2[%c21] : memref<64xf32, #tpu.memory_space<smem>>
    %c22 = arith.constant 22 : index
    %139 = memref.load %arg2[%c22] : memref<64xf32, #tpu.memory_space<smem>>
    %c23 = arith.constant 23 : index
    %140 = memref.load %arg2[%c23] : memref<64xf32, #tpu.memory_space<smem>>
    %141 = vector.broadcast %139 : f32 to vector<8x256xf32>
    %142 = arith.mulf %141, %1 : vector<8x256xf32>
    %143 = vector.broadcast %137 : f32 to vector<8x256xf32>
    %144 = arith.addf %143, %142 : vector<8x256xf32>
    %145 = vector.broadcast %140 : f32 to vector<8x256xf32>
    %146 = arith.mulf %145, %1 : vector<8x256xf32>
    %147 = vector.broadcast %138 : f32 to vector<8x256xf32>
    %148 = arith.addf %147, %146 : vector<8x256xf32>
    %149 = arith.mulf %0, %148 : vector<8x256xf32>
    %150 = arith.addf %144, %149 : vector<8x256xf32>
    %151 = arith.mulf %28, %150 : vector<8x256xf32>
    %152 = arith.addf %136, %151 : vector<8x256xf32>
    %c24 = arith.constant 24 : index
    %153 = memref.load %arg2[%c24] : memref<64xf32, #tpu.memory_space<smem>>
    %c25 = arith.constant 25 : index
    %154 = memref.load %arg2[%c25] : memref<64xf32, #tpu.memory_space<smem>>
    %c26 = arith.constant 26 : index
    %155 = memref.load %arg2[%c26] : memref<64xf32, #tpu.memory_space<smem>>
    %c27 = arith.constant 27 : index
    %156 = memref.load %arg2[%c27] : memref<64xf32, #tpu.memory_space<smem>>
    %157 = vector.broadcast %155 : f32 to vector<8x256xf32>
    %158 = arith.mulf %157, %1 : vector<8x256xf32>
    %159 = vector.broadcast %153 : f32 to vector<8x256xf32>
    %160 = arith.addf %159, %158 : vector<8x256xf32>
    %161 = vector.broadcast %156 : f32 to vector<8x256xf32>
    %162 = arith.mulf %161, %1 : vector<8x256xf32>
    %163 = vector.broadcast %154 : f32 to vector<8x256xf32>
    %164 = arith.addf %163, %162 : vector<8x256xf32>
    %165 = arith.mulf %0, %164 : vector<8x256xf32>
    %166 = arith.addf %160, %165 : vector<8x256xf32>
    %167 = arith.mulf %29, %166 : vector<8x256xf32>
    %168 = arith.addf %152, %167 : vector<8x256xf32>
    %c28 = arith.constant 28 : index
    %169 = memref.load %arg2[%c28] : memref<64xf32, #tpu.memory_space<smem>>
    %c29 = arith.constant 29 : index
    %170 = memref.load %arg2[%c29] : memref<64xf32, #tpu.memory_space<smem>>
    %c30 = arith.constant 30 : index
    %171 = memref.load %arg2[%c30] : memref<64xf32, #tpu.memory_space<smem>>
    %c31 = arith.constant 31 : index
    %172 = memref.load %arg2[%c31] : memref<64xf32, #tpu.memory_space<smem>>
    %173 = vector.broadcast %171 : f32 to vector<8x256xf32>
    %174 = arith.mulf %173, %1 : vector<8x256xf32>
    %175 = vector.broadcast %169 : f32 to vector<8x256xf32>
    %176 = arith.addf %175, %174 : vector<8x256xf32>
    %177 = vector.broadcast %172 : f32 to vector<8x256xf32>
    %178 = arith.mulf %177, %1 : vector<8x256xf32>
    %179 = vector.broadcast %170 : f32 to vector<8x256xf32>
    %180 = arith.addf %179, %178 : vector<8x256xf32>
    %181 = arith.mulf %0, %180 : vector<8x256xf32>
    %182 = arith.addf %176, %181 : vector<8x256xf32>
    %183 = arith.mulf %30, %182 : vector<8x256xf32>
    %184 = arith.addf %168, %183 : vector<8x256xf32>
    %185 = arith.mulf %121, %184 : vector<8x256xf32>
    %186 = arith.addf %120, %185 : vector<8x256xf32>
    %187 = arith.subf %45, %50 : vector<8x256xf32>
    %c32 = arith.constant 32 : index
    %188 = memref.load %arg2[%c32] : memref<64xf32, #tpu.memory_space<smem>>
    %c33 = arith.constant 33 : index
    %189 = memref.load %arg2[%c33] : memref<64xf32, #tpu.memory_space<smem>>
    %c34 = arith.constant 34 : index
    %190 = memref.load %arg2[%c34] : memref<64xf32, #tpu.memory_space<smem>>
    %c35 = arith.constant 35 : index
    %191 = memref.load %arg2[%c35] : memref<64xf32, #tpu.memory_space<smem>>
    %192 = vector.broadcast %190 : f32 to vector<8x256xf32>
    %193 = arith.mulf %192, %1 : vector<8x256xf32>
    %194 = vector.broadcast %188 : f32 to vector<8x256xf32>
    %195 = arith.addf %194, %193 : vector<8x256xf32>
    %196 = vector.broadcast %191 : f32 to vector<8x256xf32>
    %197 = arith.mulf %196, %1 : vector<8x256xf32>
    %198 = vector.broadcast %189 : f32 to vector<8x256xf32>
    %199 = arith.addf %198, %197 : vector<8x256xf32>
    %200 = arith.mulf %0, %199 : vector<8x256xf32>
    %201 = arith.addf %195, %200 : vector<8x256xf32>
    %202 = arith.mulf %27, %201 : vector<8x256xf32>
    %c36 = arith.constant 36 : index
    %203 = memref.load %arg2[%c36] : memref<64xf32, #tpu.memory_space<smem>>
    %c37 = arith.constant 37 : index
    %204 = memref.load %arg2[%c37] : memref<64xf32, #tpu.memory_space<smem>>
    %c38 = arith.constant 38 : index
    %205 = memref.load %arg2[%c38] : memref<64xf32, #tpu.memory_space<smem>>
    %c39 = arith.constant 39 : index
    %206 = memref.load %arg2[%c39] : memref<64xf32, #tpu.memory_space<smem>>
    %207 = vector.broadcast %205 : f32 to vector<8x256xf32>
    %208 = arith.mulf %207, %1 : vector<8x256xf32>
    %209 = vector.broadcast %203 : f32 to vector<8x256xf32>
    %210 = arith.addf %209, %208 : vector<8x256xf32>
    %211 = vector.broadcast %206 : f32 to vector<8x256xf32>
    %212 = arith.mulf %211, %1 : vector<8x256xf32>
    %213 = vector.broadcast %204 : f32 to vector<8x256xf32>
    %214 = arith.addf %213, %212 : vector<8x256xf32>
    %215 = arith.mulf %0, %214 : vector<8x256xf32>
    %216 = arith.addf %210, %215 : vector<8x256xf32>
    %217 = arith.mulf %28, %216 : vector<8x256xf32>
    %218 = arith.addf %202, %217 : vector<8x256xf32>
    %c40 = arith.constant 40 : index
    %219 = memref.load %arg2[%c40] : memref<64xf32, #tpu.memory_space<smem>>
    %c41 = arith.constant 41 : index
    %220 = memref.load %arg2[%c41] : memref<64xf32, #tpu.memory_space<smem>>
    %c42 = arith.constant 42 : index
    %221 = memref.load %arg2[%c42] : memref<64xf32, #tpu.memory_space<smem>>
    %c43 = arith.constant 43 : index
    %222 = memref.load %arg2[%c43] : memref<64xf32, #tpu.memory_space<smem>>
    %223 = vector.broadcast %221 : f32 to vector<8x256xf32>
    %224 = arith.mulf %223, %1 : vector<8x256xf32>
    %225 = vector.broadcast %219 : f32 to vector<8x256xf32>
    %226 = arith.addf %225, %224 : vector<8x256xf32>
    %227 = vector.broadcast %222 : f32 to vector<8x256xf32>
    %228 = arith.mulf %227, %1 : vector<8x256xf32>
    %229 = vector.broadcast %220 : f32 to vector<8x256xf32>
    %230 = arith.addf %229, %228 : vector<8x256xf32>
    %231 = arith.mulf %0, %230 : vector<8x256xf32>
    %232 = arith.addf %226, %231 : vector<8x256xf32>
    %233 = arith.mulf %29, %232 : vector<8x256xf32>
    %234 = arith.addf %218, %233 : vector<8x256xf32>
    %c44 = arith.constant 44 : index
    %235 = memref.load %arg2[%c44] : memref<64xf32, #tpu.memory_space<smem>>
    %c45 = arith.constant 45 : index
    %236 = memref.load %arg2[%c45] : memref<64xf32, #tpu.memory_space<smem>>
    %c46 = arith.constant 46 : index
    %237 = memref.load %arg2[%c46] : memref<64xf32, #tpu.memory_space<smem>>
    %c47 = arith.constant 47 : index
    %238 = memref.load %arg2[%c47] : memref<64xf32, #tpu.memory_space<smem>>
    %239 = vector.broadcast %237 : f32 to vector<8x256xf32>
    %240 = arith.mulf %239, %1 : vector<8x256xf32>
    %241 = vector.broadcast %235 : f32 to vector<8x256xf32>
    %242 = arith.addf %241, %240 : vector<8x256xf32>
    %243 = vector.broadcast %238 : f32 to vector<8x256xf32>
    %244 = arith.mulf %243, %1 : vector<8x256xf32>
    %245 = vector.broadcast %236 : f32 to vector<8x256xf32>
    %246 = arith.addf %245, %244 : vector<8x256xf32>
    %247 = arith.mulf %0, %246 : vector<8x256xf32>
    %248 = arith.addf %242, %247 : vector<8x256xf32>
    %249 = arith.mulf %30, %248 : vector<8x256xf32>
    %250 = arith.addf %234, %249 : vector<8x256xf32>
    %251 = arith.mulf %187, %250 : vector<8x256xf32>
    %252 = arith.addf %186, %251 : vector<8x256xf32>
    %253 = arith.subf %50, %55 : vector<8x256xf32>
    %c48 = arith.constant 48 : index
    %254 = memref.load %arg2[%c48] : memref<64xf32, #tpu.memory_space<smem>>
    %c49 = arith.constant 49 : index
    %255 = memref.load %arg2[%c49] : memref<64xf32, #tpu.memory_space<smem>>
    %c50 = arith.constant 50 : index
    %256 = memref.load %arg2[%c50] : memref<64xf32, #tpu.memory_space<smem>>
    %c51 = arith.constant 51 : index
    %257 = memref.load %arg2[%c51] : memref<64xf32, #tpu.memory_space<smem>>
    %258 = vector.broadcast %256 : f32 to vector<8x256xf32>
    %259 = arith.mulf %258, %1 : vector<8x256xf32>
    %260 = vector.broadcast %254 : f32 to vector<8x256xf32>
    %261 = arith.addf %260, %259 : vector<8x256xf32>
    %262 = vector.broadcast %257 : f32 to vector<8x256xf32>
    %263 = arith.mulf %262, %1 : vector<8x256xf32>
    %264 = vector.broadcast %255 : f32 to vector<8x256xf32>
    %265 = arith.addf %264, %263 : vector<8x256xf32>
    %266 = arith.mulf %0, %265 : vector<8x256xf32>
    %267 = arith.addf %261, %266 : vector<8x256xf32>
    %268 = arith.mulf %27, %267 : vector<8x256xf32>
    %c52 = arith.constant 52 : index
    %269 = memref.load %arg2[%c52] : memref<64xf32, #tpu.memory_space<smem>>
    %c53 = arith.constant 53 : index
    %270 = memref.load %arg2[%c53] : memref<64xf32, #tpu.memory_space<smem>>
    %c54 = arith.constant 54 : index
    %271 = memref.load %arg2[%c54] : memref<64xf32, #tpu.memory_space<smem>>
    %c55 = arith.constant 55 : index
    %272 = memref.load %arg2[%c55] : memref<64xf32, #tpu.memory_space<smem>>
    %273 = vector.broadcast %271 : f32 to vector<8x256xf32>
    %274 = arith.mulf %273, %1 : vector<8x256xf32>
    %275 = vector.broadcast %269 : f32 to vector<8x256xf32>
    %276 = arith.addf %275, %274 : vector<8x256xf32>
    %277 = vector.broadcast %272 : f32 to vector<8x256xf32>
    %278 = arith.mulf %277, %1 : vector<8x256xf32>
    %279 = vector.broadcast %270 : f32 to vector<8x256xf32>
    %280 = arith.addf %279, %278 : vector<8x256xf32>
    %281 = arith.mulf %0, %280 : vector<8x256xf32>
    %282 = arith.addf %276, %281 : vector<8x256xf32>
    %283 = arith.mulf %28, %282 : vector<8x256xf32>
    %284 = arith.addf %268, %283 : vector<8x256xf32>
    %c56 = arith.constant 56 : index
    %285 = memref.load %arg2[%c56] : memref<64xf32, #tpu.memory_space<smem>>
    %c57 = arith.constant 57 : index
    %286 = memref.load %arg2[%c57] : memref<64xf32, #tpu.memory_space<smem>>
    %c58 = arith.constant 58 : index
    %287 = memref.load %arg2[%c58] : memref<64xf32, #tpu.memory_space<smem>>
    %c59 = arith.constant 59 : index
    %288 = memref.load %arg2[%c59] : memref<64xf32, #tpu.memory_space<smem>>
    %289 = vector.broadcast %287 : f32 to vector<8x256xf32>
    %290 = arith.mulf %289, %1 : vector<8x256xf32>
    %291 = vector.broadcast %285 : f32 to vector<8x256xf32>
    %292 = arith.addf %291, %290 : vector<8x256xf32>
    %293 = vector.broadcast %288 : f32 to vector<8x256xf32>
    %294 = arith.mulf %293, %1 : vector<8x256xf32>
    %295 = vector.broadcast %286 : f32 to vector<8x256xf32>
    %296 = arith.addf %295, %294 : vector<8x256xf32>
    %297 = arith.mulf %0, %296 : vector<8x256xf32>
    %298 = arith.addf %292, %297 : vector<8x256xf32>
    %299 = arith.mulf %29, %298 : vector<8x256xf32>
    %300 = arith.addf %284, %299 : vector<8x256xf32>
    %c60 = arith.constant 60 : index
    %301 = memref.load %arg2[%c60] : memref<64xf32, #tpu.memory_space<smem>>
    %c61 = arith.constant 61 : index
    %302 = memref.load %arg2[%c61] : memref<64xf32, #tpu.memory_space<smem>>
    %c62 = arith.constant 62 : index
    %303 = memref.load %arg2[%c62] : memref<64xf32, #tpu.memory_space<smem>>
    %c63 = arith.constant 63 : index
    %304 = memref.load %arg2[%c63] : memref<64xf32, #tpu.memory_space<smem>>
    %305 = vector.broadcast %303 : f32 to vector<8x256xf32>
    %306 = arith.mulf %305, %1 : vector<8x256xf32>
    %307 = vector.broadcast %301 : f32 to vector<8x256xf32>
    %308 = arith.addf %307, %306 : vector<8x256xf32>
    %309 = vector.broadcast %304 : f32 to vector<8x256xf32>
    %310 = arith.mulf %309, %1 : vector<8x256xf32>
    %311 = vector.broadcast %302 : f32 to vector<8x256xf32>
    %312 = arith.addf %311, %310 : vector<8x256xf32>
    %313 = arith.mulf %0, %312 : vector<8x256xf32>
    %314 = arith.addf %308, %313 : vector<8x256xf32>
    %315 = arith.mulf %30, %314 : vector<8x256xf32>
    %316 = arith.addf %300, %315 : vector<8x256xf32>
    %317 = arith.mulf %253, %316 : vector<8x256xf32>
    %318 = arith.addf %252, %317 : vector<8x256xf32>
    %c0_23 = arith.constant 0 : index
    %c0_24 = arith.constant 0 : index
    %319 = vector.load %arg5[%c0_23, %c0_24] : memref<8x256xf32, #tpu.memory_space<vmem>>, vector<8x256xf32>
    tpu.vector_store %arg5[%c0_23, %c0_24], %318 {strides = array<i32>} : memref<8x256xf32, #tpu.memory_space<vmem>>, vector<8x256xf32>,
    return
  }
  func.func @transform_0(%arg0: i32) -> i32 {
    %c0_i32 = arith.constant 0 : i32
    %c0_i32_0 = arith.constant 0 : i32
    return %c0_i32 : i32
  }
  func.func @transform_1(%arg0: i32) -> i32 {
    %c0_i32 = arith.constant 0 : i32
    %c0_i32_0 = arith.constant 0 : i32
    return %c0_i32 : i32
  }
  func.func @transform_2(%arg0: i32) -> (i32, i32) {
    %c0_i32 = arith.constant 0 : i32
    %c0_i32_0 = arith.constant 0 : i32
    return %arg0, %c0_i32 : i32, i32
  }
  func.func @transform_3(%arg0: i32) -> (i32, i32) {
    %c0_i32 = arith.constant 0 : i32
    %c0_i32_0 = arith.constant 0 : i32
    return %arg0, %c0_i32 : i32, i32
  }
  func.func @transform_4(%arg0: i32) -> (i32, i32) {
    %c0_i32 = arith.constant 0 : i32
    %c0_i32_0 = arith.constant 0 : i32
    return %arg0, %c0_i32 : i32, i32
  }
}

</mosaic_0001>

<bundles_post_ra>
// kernel: tpu_custom_call.1
= control target key start
LH: loop header
LB: loop body
LE: loop exit
PB: predicated region body
PF: predicated region fallthrough
CT: control target
= control target key end

     0   :  { %9 = vsyncpa [#allocation5], 0  ;;  %s1278_s0 = inlined_call_operand.hbm [shape: f32[10], index: 0, kind: input, shape index: {}]   ;;  %s1279_s1 = inlined_call_operand.vmem [shape: f32[64], index: 1, kind: input, shape index: {}]   ;;  %s1280_s2 = inlined_call_operand.hbm [shape: f32[8,256], index: 2, kind: input, shape index: {}]   ;;  %s1281_s3 = inlined_call_operand.hbm [shape: f32[8,256], index: 3, kind: input, shape index: {}]   ;;  %s1282_s4 = inlined_call_operand.hbm [shape: f32[8,256], index: 4, kind: output, shape index: {}]  }
   0x1   :  { %10 = vsyncpa [#allocation6], 0 }
   0x2   :  { %11 = vsyncpa [#allocation3], 0 }
   0x3   :  { %12 = vsyncpa [#allocation10], 0 }
   0x4   :  { %13 = vsyncpa [#allocation4], 0  ;;  %s28_s17 = sshll.u32 %s1279_s1, 4  ;;  %s632_s20 = scalar_lea.hbm %s1278_s0, 16  ;;  %s29_s17 = int_to_ptr.vmem [resolvable:$true] %s28_s17 }
   0x5   :  { %p633_p0 = scmp.ne.s32.totalorder %s1278_s0, %s632_s20  ;;  %p636_p1 = scmp.lt.u32.totalorder %s632_s20, %s1278_s0 }
   0x7   :  { %p638_p2 = pnand %p636_p1, %p633_p0 }
   0x9   :  { %641 = shalt.err (!%p638_p2)
}
   0xa   :  { %s730_s25 = smov [#allocation2]   ;;  %s642_s1 = scalar_lea.vmem %s29_s17, 16 }
   0xb   :  { %21 = dma.hbm_to_smem %s1278_s0, 16, %s730_s25, [#allocation5]  }
   0xc   :  { %p643_p3 = scmp.ne.s32.totalorder %s29_s17, %s642_s1  ;;  %p647_p4 = scmp.lt.s32.totalorder %s29_s17, %s29_s17 }
   0xd   :  { %p648_p5 = scmp.lt.s32.totalorder %s642_s1, %s642_s1 }
   0xf   :  { %p649_p6 = por %p648_p5, %p647_p4 }
  0x11   :  { %p650_p7 = pnand %p649_p6, %p643_p3 }
  0x13   :  { %653 = shalt.err (!%p650_p7)
}
  0x14   :  { %s731_s28 = smov [#allocation7]   ;;  %s732_s29 = smov [#allocation8]  }
  0x15   :  { %31 = dma.vmem_to_smem %s29_s17, 16, %s731_s28, [#allocation6]  }
  0x16   :  { %s38_s30 = sshll.u32 %s732_s29, 4  ;;  %s733_s5 = smov [#allocation9]   ;;  %s39_s30 = int_to_ptr.vmem [resolvable:$true] %s38_s30 }
  0x17   :  { %s48_s6 = sshll.u32 %s733_s5, 4  ;;  %s654_s0 = scalar_lea.hbm %s1280_s2, 256  ;;  %s49_s6 = int_to_ptr.vmem [resolvable:$true] %s48_s6 }
  0x18   :  { %p655_p8 = scmp.ne.s32.totalorder %s1280_s2, %s654_s0  ;;  %p658_p9 = scmp.lt.u32.totalorder %s654_s0, %s1280_s2 }
  0x1a   :  { %p660_p10 = pnand %p658_p9, %p655_p8 }
  0x1c   :  { %663 = shalt.err (!%p660_p10)
}
  0x1d   :  { %s664_s13 = scalar_lea.vmem %s39_s30, 256  ;;  %p669_p12 = scmp.lt.s32.totalorder %s39_s30, %s39_s30 }
  0x1e   :  { %p665_p11 = scmp.ne.s32.totalorder %s39_s30, %s664_s13  ;;  %p670_p13 = scmp.lt.s32.totalorder %s664_s13, %s664_s13 }
  0x20   :  { %p671_p0 = por %p670_p13, %p669_p12 }
  0x22   :  { %p672_p1 = pnand %p671_p0, %p665_p11 }
  0x24   :  { %675 = shalt.err (!%p672_p1)
}
  0x25   :  { %41 = dma.hbm_to_vmem [thread:$0]  %s1280_s2, 256, %s39_s30, [#allocation3]  }
  0x26   :  { %s676_s18 = scalar_lea.hbm %s1281_s3, 256 }
  0x27   :  { %p677_p2 = scmp.ne.s32.totalorder %s1281_s3, %s676_s18  ;;  %p680_p3 = scmp.lt.u32.totalorder %s676_s18, %s1281_s3 }
  0x29   :  { %p682_p4 = pnand %p680_p3, %p677_p2 }
  0x2b   :  { %685 = shalt.err (!%p682_p4)
}
  0x2c   :  { %s686_s23 = scalar_lea.vmem %s49_s6, 256  ;;  %p691_p6 = scmp.lt.s32.totalorder %s49_s6, %s49_s6 }
  0x2d   :  { %p687_p5 = scmp.ne.s32.totalorder %s49_s6, %s686_s23  ;;  %p692_p7 = scmp.lt.s32.totalorder %s686_s23, %s686_s23 }
  0x2f   :  { %p693_p8 = por %p692_p7, %p691_p6 }
  0x31   :  { %p694_p9 = pnand %p693_p8, %p687_p5 }
  0x33   :  { %697 = shalt.err (!%p694_p9)
}
  0x34   :  { %51 = dma.hbm_to_vmem [thread:$0]  %s1281_s3, 256, %s49_s6, [#allocation10]  }
  0x35   :  { %720 = dma.done.wait [#allocation5], 16  }
  0x36   :  { %721 = vsyncadd [#allocation5], 4294967280 }
  0x37   :  { %722 = dma.done.wait [#allocation6], 16  }
  0x38   :  { %723 = vsyncadd [#allocation6], 4294967280 }
  0x39   :  { %724 = dma.done.wait [#allocation3], 256  }
  0x3a   :  { %725 = vsyncadd [#allocation3], 4294967040 }
  0x3b   :  { %726 = dma.done.wait [#allocation10], 256  }
  0x3c   :  { %727 = vsyncadd [#allocation10], 4294967040 }
  0x3d   :  { %64 = sfence }
  0x3e   :  { %s555_s25 = sld [smem:[#allocation2 + $0x5]]  ;;  %s556_s26 = sld [smem:[#allocation2 + $0x6]]  ;;  %v799_v0 = vld [vmem:[#allocation9] sm:$0xff]  ;;  %v805_v2 = vld [vmem:[#allocation9 + $0x8] sm:$0xff]  ;;  %v833_v28 = vld [vmem:[#allocation8] sm:$0xff] }
  0x3f   :  { %s557_s27 = sld [smem:[#allocation2 + $0x7]]  ;;  %s558_s1 = sld [smem:[#allocation2 + $0x8]]  ;;  %v835_v29 = vld [vmem:[#allocation8 + $0x8] sm:$0xff] }
  0x40   :  { %s559_s28 = sld [smem:[#allocation2 + $0x9]]  ;;  %s801_s29 = sld [smem:[#allocation2]] }
  0x41   :  { %s803_s3 = sld [smem:[#allocation2 + $0x1]]  ;;  %s811_s30 = sld [smem:[#allocation2 + $0x2]] }
  0x42   :  { %s814_s5 = sld [smem:[#allocation2 + $0x3]]  ;;  %s821_s6 = sld [smem:[#allocation7 + $0x2]] }
  0x43   :  { %s823_s7 = sld [smem:[#allocation7]]  ;;  %s827_s8 = sld [smem:[#allocation7 + $0x3]] }
  0x44   :  { %v70_v1 = vstv %s555_s25  ;;  %v76_v4 = vstv %s556_s26  ;;  %s829_s0 = sld [smem:[#allocation7 + $0x6]]  ;;  %s831_s9 = sld [smem:[#allocation7 + $0x1]] }
  0x45   :  { %v71_v3 = vsub.f32 %v799_v0, %v70_v1  ;;  %v82_v5 = vstv %s557_s27  ;;  %v72_v6 = vsub.f32 %v805_v2, %v70_v1  ;;  %v77_v7 = vsub.f32 %v799_v0, %v76_v4  ;;  %s852_s10 = sld [smem:[#allocation7 + $0x4]]  ;;  %s854_s11 = sld [smem:[#allocation7 + $0x7]] }
  0x46   :  { %v78_v8 = vsub.f32 %v805_v2, %v76_v4  ;;  %v83_v9 = vsub.f32 %v799_v0, %v82_v5  ;;  %v88_v10 = vstv %s558_s1  ;;  %v94_v11 = vstv %s559_s28  ;;  %s865_s12 = sld [smem:[#allocation7 + $0x5]]  ;;  %s867_s13 = sld [smem:[#allocation7 + $0xa]] }
  0x47   :  { %v84_v12 = vsub.f32 %v805_v2, %v82_v5  ;;  %v73_v13 = vmax.f32 %v71_v3, 0.0  ;;  %v89_v14 = vsub.f32 %v799_v0, %v88_v10  ;;  %v90_v15 = vsub.f32 %v805_v2, %v88_v10  ;;  %s888_s14 = sld [smem:[#allocation7 + $0xb]]  ;;  %s898_s15 = sld [smem:[#allocation7 + $0x8]] }
  0x48   :  { %v95_v16 = vsub.f32 %v799_v0, %v94_v11  ;;  %v74_v17 = vmax.f32 %v72_v6, 0.0  ;;  %v79_v18 = vmax.f32 %v77_v7, 0.0  ;;  %v80_v19 = vmax.f32 %v78_v8, 0.0  ;;  %s904_s16 = sld [smem:[#allocation7 + $0x9]]  ;;  %s910_s17 = sld [smem:[#allocation7 + $0xe]] }
  0x49   :  { %v96_v20 = vsub.f32 %v805_v2, %v94_v11  ;;  %v85_v21 = vmax.f32 %v83_v9, 0.0  ;;  %v86_v22 = vmax.f32 %v84_v12, 0.0  ;;  %v91_v23 = vmax.f32 %v89_v14, 0.0  ;;  %s913_s18 = sld [smem:[#allocation2 + $0x4]]  ;;  %s919_s19 = sld [smem:[#allocation7 + $0xf]] }
  0x4a   :  { %v108_v24 = vstv %s801_s29  ;;  %v114_v25 = vstv %s803_s3  ;;  %v92_v26 = vmax.f32 %v90_v15, 0.0  ;;  %v97_v27 = vmax.f32 %v95_v16, 0.0  ;;  %s928_s20 = sld [smem:[#allocation7 + $0xc]]  ;;  %s930_s21 = sld [smem:[#allocation7 + $0xd]] }
  0x4b   :  { %v98_v30 = vmax.f32 %v96_v20, 0.0  ;;  %v837_v31 = vsub.f32 %v73_v13, %v79_v18  ;;  %v839_v32 = vsub.f32 %v74_v17, %v80_v19  ;;  %v120_v33 = vstv %s811_s30  ;;  %s938_s22 = sld [smem:[#allocation7 + $0x12]]  ;;  %s940_s23 = sld [smem:[#allocation7 + $0x13]] }
  0x4c   :  { %v843_v34 = vsub.f32 %v833_v28, %v108_v24  ;;  %v846_v35 = vsub.f32 %v835_v29, %v108_v24  ;;  %v849_v36 = vsub.f32 %v833_v28, %v114_v25  ;;  %v126_v37 = vstv %s814_s5  ;;  %s948_s2 = sld [smem:[#allocation7 + $0x11]]  ;;  %s950_s24 = sld [smem:[#allocation7 + $0x16]] }
  0x4d   :  { %v856_v38 = vsub.f32 %v79_v18, %v85_v21  ;;  %v858_v39 = vsub.f32 %v80_v19, %v86_v22  ;;  %v860_v40 = vsub.f32 %v85_v21, %v91_v23  ;;  %v863_v41 = vsub.f32 %v835_v29, %v114_v25  ;;  %s961_s25 = sld [smem:[#allocation7 + $0x10]]  ;;  %s970_s26 = sld [smem:[#allocation7 + $0x17]] }
  0x4e   :  { %v869_v42 = vsub.f32 %v86_v22, %v92_v26  ;;  %v871_v43 = vsub.f32 %v91_v23, %v97_v27  ;;  %v874_v44 = vsub.f32 %v833_v28, %v120_v33  ;;  %v877_v45 = vsub.f32 %v835_v29, %v120_v33  ;;  %s981_s27 = sld [smem:[#allocation7 + $0x14]]  ;;  %s989_s1 = sld [smem:[#allocation7 + $0x15]] }
  0x4f   :  { %v879_v46 = vsub.f32 %v92_v26, %v98_v30  ;;  %v882_v47 = vsub.f32 %v833_v28, %v126_v37  ;;  %v885_v48 = vsub.f32 %v835_v29, %v126_v37  ;;  %v143_v49 = vstv %s821_s6  ;;  %s991_s28 = sld [smem:[#allocation7 + $0x1a]]  ;;  %s1000_s29 = sld [smem:[#allocation7 + $0x18]] }
  0x50   :  { %v111_v50 = vmax.f32 %v843_v34, 0.0  ;;  %v112_v51 = vmax.f32 %v846_v35, 0.0  ;;  %v117_v52 = vmax.f32 %v849_v36, 0.0  ;;  %v144_v53 = vmul.f32 %v143_v49, %v799_v0  ;;  %s1002_s3 = sld [smem:[#allocation7 + $0x1b]]  ;;  %s1019_s30 = sld [smem:[#allocation7 + $0x19]] }
  0x51   :  { %v118_v54 = vmax.f32 %v863_v41, 0.0  ;;  %v146_v55 = vstv %s823_s7  ;;  %v149_v56 = vstv %s827_s8  ;;  %v165_v57 = vstv %s829_s0  ;;  %s1021_s5 = sld [smem:[#allocation7 + $0x1e]]  ;;  %s1028_s6 = sld [smem:[#allocation7 + $0x1f]] }
  0x52   :  { %v123_v58 = vmax.f32 %v874_v44, 0.0  ;;  %v124_v59 = vmax.f32 %v877_v45, 0.0  ;;  %v145_v60 = vmul.f32 %v143_v49, %v805_v2  ;;  %v152_v61 = vstv %s831_s9  ;;  %s1036_s7 = sld [smem:[#allocation7 + $0x1c]]  ;;  %s1041_s8 = sld [smem:[#allocation7 + $0x1d]] }
  0x53   :  { %v150_v62 = vmul.f32 %v149_v56, %v799_v0  ;;  %v151_v63 = vmul.f32 %v149_v56, %v805_v2  ;;  %v166_v1 = vmul.f32 %v165_v57, %v799_v0  ;;  %v167_v3 = vmul.f32 %v165_v57, %v805_v2  ;;  %s1043_s0 = sld [smem:[#allocation7 + $0x22]]  ;;  %s1052_s9 = sld [smem:[#allocation7 + $0x23]] }
  0x54   :  { %v129_v4 = vmax.f32 %v882_v47, 0.0  ;;  %v147_v5 = vadd.f32 %v146_v55, %v144_v53  ;;  %v168_v6 = vstv %s852_s10  ;;  %v171_v7 = vstv %s854_s11  ;;  %s1054_s10 = sld [smem:[#allocation7 + $0x20]]  ;;  %s1062_s11 = sld [smem:[#allocation7 + $0x21]] }
  0x55   :  { %v153_v8 = vadd.f32 %v152_v61, %v150_v62  ;;  %v154_v9 = vadd.f32 %v152_v61, %v151_v63  ;;  %v174_v10 = vstv %s865_s12  ;;  %v189_v11 = vstv %s867_s13  ;;  %s1064_s12 = sld [smem:[#allocation7 + $0x26]]  ;;  %s1073_s13 = sld [smem:[#allocation7 + $0x24]] }
  0x56   :  { %v148_v12 = vadd.f32 %v146_v55, %v145_v60  ;;  %v169_v13 = vadd.f32 %v168_v6, %v166_v1  ;;  %v172_v14 = vmul.f32 %v171_v7, %v799_v0  ;;  %v173_v15 = vmul.f32 %v171_v7, %v805_v2 }
  0x57   :  { %v155_v16 = vmul.f32 %v153_v8, %v833_v28  ;;  %v156_v17 = vmul.f32 %v154_v9, %v835_v29  ;;  %v170_v18 = vadd.f32 %v168_v6, %v167_v3  ;;  %v195_v19 = vstv %s888_s14  ;;  %s1075_s14 = sld [smem:[#allocation7 + $0x27]] }
  0x58   :  { %v175_v20 = vadd.f32 %v174_v10, %v172_v14  ;;  %v176_v21 = vadd.f32 %v174_v10, %v173_v15  ;;  %v190_v22 = vmul.f32 %v189_v11, %v799_v0  ;;  %v191_v23 = vmul.f32 %v189_v11, %v805_v2 }
  0x59   :  { %v157_v24 = vadd.f32 %v155_v16, %v147_v5  ;;  %v192_v25 = vstv %s898_s15  ;;  %v196_v26 = vmul.f32 %v195_v19, %v799_v0  ;;  %v197_v27 = vmul.f32 %v195_v19, %v805_v2  ;;  %s1084_s15 = sld [smem:[#allocation7 + $0x25]] }
  0x5a   :  { %v158_v30 = vadd.f32 %v156_v17, %v148_v12  ;;  %v177_v33 = vmul.f32 %v175_v20, %v833_v28  ;;  %v178_v37 = vmul.f32 %v176_v21, %v835_v29  ;;  %v198_v49 = vstv %s904_s16  ;;  %s1088_s16 = sld [smem:[#allocation7 + $0x2a]] }
  0x5b   :  { %v130_v53 = vmax.f32 %v885_v48, 0.0  ;;  %v199_v55 = vadd.f32 %v198_v49, %v196_v26  ;;  %v200_v56 = vadd.f32 %v198_v49, %v197_v27  ;;  %v213_v57 = vstv %s910_s17  ;;  %s1098_s17 = sld [smem:[#allocation7 + $0x2b]] }
  0x5c   :  { %v132_v60 = vstv %s913_s18  ;;  %v179_v61 = vadd.f32 %v177_v33, %v169_v13  ;;  %v180_v62 = vadd.f32 %v178_v37, %v170_v18  ;;  %v193_v63 = vadd.f32 %v192_v25, %v190_v22  ;;  %s1100_s18 = sld [smem:[#allocation7 + $0x2e]] }
  0x5d   :  { %v194_v1 = vadd.f32 %v192_v25, %v191_v23  ;;  %v201_v3 = vmul.f32 %v199_v55, %v833_v28  ;;  %v202_v5 = vmul.f32 %v200_v56, %v835_v29  ;;  %v219_v6 = vstv %s919_s19  ;;  %s1106_s19 = sld [smem:[#allocation7 + $0x28]] }
  0x5e   :  { %v956_v7 = vsub.f32 %v111_v50, %v117_v52  ;;  %v159_v8 = vmul.f32 %v157_v24, %v837_v31  ;;  %v160_v9 = vmul.f32 %v158_v30, %v839_v32  ;;  %v214_v10 = vmul.f32 %v213_v57, %v799_v0 }
  0x5f   :  { %v181_v11 = vmul.f32 %v179_v61, %v856_v38  ;;  %v215_v12 = vmul.f32 %v213_v57, %v805_v2  ;;  %v220_v13 = vmul.f32 %v219_v6, %v799_v0  ;;  %v221_v34 = vmul.f32 %v219_v6, %v805_v2 }
  0x60   :  { %v182_v50 = vmul.f32 %v180_v62, %v858_v39  ;;  %v203_v14 = vadd.f32 %v201_v3, %v193_v63  ;;  %v216_v15 = vstv %s928_s20  ;;  %v222_v16 = vstv %s930_s21  ;;  %s1108_s20 = sld [smem:[#allocation7 + $0x29]]  ;;  %s1115_s21 = sld [smem:[#allocation7 + $0x2c]] }
  0x61   :  { %v973_v17 = vsub.f32 %v833_v28, %v132_v60  ;;  %v979_v18 = vsub.f32 %v112_v51, %v118_v54  ;;  %v204_v19 = vadd.f32 %v202_v5, %v194_v1  ;;  %v223_v20 = vadd.f32 %v222_v16, %v220_v13 }
  0x62   :  { %v984_v21 = vsub.f32 %v835_v29, %v132_v60  ;;  %v224_v22 = vadd.f32 %v222_v16, %v221_v34  ;;  %v241_v23 = vstv %s938_s22  ;;  %v247_v24 = vstv %s940_s23  ;;  %s1117_s22 = sld [smem:[#allocation7 + $0x2f]]  ;;  %s1133_s23 = sld [smem:[#allocation7 + $0x2d]] }
  0x63   :  { %v183_v25 = vadd.f32 %v181_v11, %v159_v8  ;;  %v217_v26 = vadd.f32 %v216_v15, %v214_v10  ;;  %v218_v27 = vadd.f32 %v216_v15, %v215_v12  ;;  %v225_v35 = vmul.f32 %v223_v20, %v833_v28 }
  0x64   :  { %v184_v51 = vadd.f32 %v182_v50, %v160_v9  ;;  %v205_v30 = vmul.f32 %v203_v14, %v860_v40  ;;  %v248_v33 = vmul.f32 %v247_v24, %v799_v0  ;;  %v249_v37 = vmul.f32 %v247_v24, %v805_v2 }
  0x65   :  { %v206_v49 = vmul.f32 %v204_v19, %v869_v42  ;;  %v242_v55 = vmul.f32 %v241_v23, %v799_v0  ;;  %v250_v56 = vstv %s948_s2  ;;  %v263_v57 = vstv %s950_s24  ;;  %s1138_s2 = sld [smem:[#allocation7 + $0x32]]  ;;  %s1146_s24 = sld [smem:[#allocation7 + $0x30]] }
  0x66   :  { %v226_v60 = vmul.f32 %v224_v22, %v835_v29  ;;  %v243_v61 = vmul.f32 %v241_v23, %v805_v2  ;;  %v244_v62 = vstv %s961_s25  ;;  %v251_v63 = vadd.f32 %v250_v56, %v248_v33  ;;  %s1148_s25 = sld [smem:[#allocation7 + $0x33]] }
  0x67   :  { %v227_v1 = vadd.f32 %v225_v35, %v217_v26  ;;  %v1011_v3 = vsub.f32 %v117_v52, %v123_v58  ;;  %v1017_v5 = vsub.f32 %v118_v54, %v124_v59  ;;  %v252_v6 = vadd.f32 %v250_v56, %v249_v37 }
  0x68   :  { %v207_v8 = vadd.f32 %v205_v30, %v183_v25  ;;  %v264_v9 = vmul.f32 %v263_v57, %v799_v0  ;;  %v265_v36 = vmul.f32 %v263_v57, %v805_v2  ;;  %v269_v52 = vstv %s970_s26  ;;  %s1158_s26 = sld [smem:[#allocation7 + $0x31]] }
  0x69   :  { %v208_v10 = vadd.f32 %v206_v49, %v184_v51  ;;  %v245_v11 = vadd.f32 %v244_v62, %v242_v55  ;;  %v253_v12 = vmul.f32 %v251_v63, %v833_v28  ;;  %v266_v41 = vstv %s981_s27  ;;  %s1160_s27 = sld [smem:[#allocation7 + $0x36]] }
  0x6a   :  { %v228_v54 = vadd.f32 %v226_v60, %v218_v27  ;;  %v246_v13 = vadd.f32 %v244_v62, %v243_v61  ;;  %v270_v34 = vmul.f32 %v269_v52, %v799_v0  ;;  %v271_v50 = vmul.f32 %v269_v52, %v805_v2 }
  0x6b   :  { %v229_v14 = vmul.f32 %v227_v1, %v871_v43  ;;  %v254_v15 = vmul.f32 %v252_v6, %v835_v29  ;;  %v272_v16 = vstv %s989_s1  ;;  %v287_v19 = vstv %s991_s28  ;;  %s1168_s1 = sld [smem:[#allocation7 + $0x37]]  ;;  %s1171_s28 = sld [smem:[#allocation7 + $0x34]] }
  0x6c   :  { %v267_v20 = vadd.f32 %v266_v41, %v264_v9  ;;  %v268_v22 = vadd.f32 %v266_v41, %v265_v36  ;;  %v273_v23 = vadd.f32 %v272_v16, %v270_v34  ;;  %v274_v24 = vadd.f32 %v272_v16, %v271_v50 }
  0x6d   :  { %v255_v25 = vadd.f32 %v253_v12, %v245_v11  ;;  %v288_v26 = vmul.f32 %v287_v19, %v799_v0  ;;  %v290_v27 = vstv %s1000_s29  ;;  %v293_v35 = vstv %s1002_s3  ;;  %s1179_s29 = sld [smem:[#allocation7 + $0x35]]  ;;  %s1183_s3 = sld [smem:[#allocation7 + $0x3a]] }
  0x6e   :  { %v275_v51 = vmul.f32 %v273_v23, %v833_v28  ;;  %v276_v30 = vmul.f32 %v274_v24, %v835_v29  ;;  %v294_v33 = vmul.f32 %v293_v35, %v799_v0  ;;  %v295_v37 = vmul.f32 %v293_v35, %v805_v2 }
  0x6f   :  { %v256_v49 = vadd.f32 %v254_v15, %v246_v13  ;;  %v289_v55 = vmul.f32 %v287_v19, %v805_v2  ;;  %v296_v56 = vstv %s1019_s30  ;;  %v311_v57 = vstv %s1021_s5  ;;  %s1185_s30 = sld [smem:[#allocation7 + $0x3b]]  ;;  %s1189_s5 = sld [smem:[#allocation7 + $0x38]] }
  0x70   :  { %v277_v60 = vadd.f32 %v275_v51, %v267_v20  ;;  %v278_v61 = vadd.f32 %v276_v30, %v268_v22  ;;  %v297_v62 = vadd.f32 %v296_v56, %v294_v33  ;;  %v298_v63 = vadd.f32 %v296_v56, %v295_v37 }
  0x71   :  { %v230_v1 = vmul.f32 %v228_v54, %v879_v46  ;;  %v231_v6 = vadd.f32 %v229_v14, %v207_v8  ;;  %v291_v9 = vadd.f32 %v290_v27, %v288_v26  ;;  %v317_v36 = vstv %s1028_s6  ;;  %s1194_s6 = sld [smem:[#allocation7 + $0x39]] }
  0x72   :  { %v257_v52 = vmul.f32 %v255_v25, %v837_v31  ;;  %v299_v11 = vmul.f32 %v297_v62, %v833_v28  ;;  %v312_v12 = vmul.f32 %v311_v57, %v799_v0  ;;  %v313_v41 = vmul.f32 %v311_v57, %v805_v2 }
  0x73   :  { %v279_v13 = vmul.f32 %v277_v60, %v856_v38  ;;  %v314_v54 = vstv %s1036_s7  ;;  %v318_v8 = vmul.f32 %v317_v36, %v799_v0  ;;  %v319_v34 = vmul.f32 %v317_v36, %v805_v2  ;;  %s1196_s7 = sld [smem:[#allocation7 + $0x3e]] }
  0x74   :  { %v258_v50 = vmul.f32 %v256_v49, %v839_v32  ;;  %v280_v14 = vmul.f32 %v278_v61, %v858_v39  ;;  %v292_v15 = vadd.f32 %v290_v27, %v289_v55  ;;  %v300_v16 = vmul.f32 %v298_v63, %v835_v29 }
  0x75   :  { %v232_v19 = vadd.f32 %v230_v1, %v208_v10  ;;  %v301_v20 = vadd.f32 %v299_v11, %v291_v9  ;;  %v320_v22 = vstv %s1041_s8  ;;  %v341_v23 = vstv %s1043_s0  ;;  %s1217_s8 = sld [smem:[#allocation7 + $0x3c]]  ;;  %s1219_s0 = sld [smem:[#allocation7 + $0x3f]] }
  0x76   :  { %v1080_v24 = vmul.f32 %v231_v6, %v956_v7  ;;  %v315_v25 = vadd.f32 %v314_v54, %v312_v12  ;;  %v321_v26 = vadd.f32 %v320_v22, %v318_v8  ;;  %v322_v35 = vadd.f32 %v320_v22, %v319_v34 }
  0x77   :  { %v281_v51 = vadd.f32 %v279_v13, %v257_v52  ;;  %v316_v27 = vadd.f32 %v314_v54, %v313_v41  ;;  %v342_v30 = vmul.f32 %v341_v23, %v799_v0  ;;  %v347_v33 = vstv %s1052_s9  ;;  %s1228_s9 = sld [smem:[#allocation7 + $0x3d]] }
  0x78   :  { %v282_v10 = vadd.f32 %v280_v14, %v258_v50  ;;  %v302_v37 = vadd.f32 %v300_v16, %v292_v15  ;;  %v323_v49 = vmul.f32 %v321_v26, %v833_v28  ;;  %v344_v55 = vstv %s1054_s10  ;;  %s734_s10 = smov [#allocation11]  }
  0x79   :  { %v303_v7 = vmul.f32 %v301_v20, %v860_v40  ;;  %v324_v56 = vmul.f32 %v322_v35, %v835_v29  ;;  %v348_v57 = vmul.f32 %v347_v33, %v799_v0  ;;  %v349_v60 = vmul.f32 %v347_v33, %v805_v2 }
  0x7a   :  { %v325_v61 = vadd.f32 %v323_v49, %v315_v25  ;;  %v343_v62 = vmul.f32 %v341_v23, %v805_v2  ;;  %v350_v63 = vstv %s1062_s11  ;;  %v363_v1 = vstv %s1064_s12  ;;  %s543_s11 = sshll.u32 %s734_s10, 4  ;;  %s544_s11 = int_to_ptr.vmem [resolvable:$true] %s543_s11 }
  0x7b   :  { %v345_v6 = vadd.f32 %v344_v55, %v342_v30  ;;  %v351_v9 = vadd.f32 %v350_v63, %v348_v57  ;;  %v352_v36 = vadd.f32 %v350_v63, %v349_v60  ;;  %v364_v52 = vmul.f32 %v363_v1, %v799_v0  ;;  %s698_s12 = scalar_lea.vmem %s544_s11, 256  ;;  %p703_p11 = scmp.lt.s32.totalorder %s544_s11, %s544_s11 }
  0x7c   :  { %v304_v11 = vmul.f32 %v302_v37, %v869_v42  ;;  %v365_v12 = vmul.f32 %v363_v1, %v805_v2  ;;  %v366_v41 = vstv %s1073_s13  ;;  %v369_v13 = vstv %s1075_s14  ;;  %p699_p10 = scmp.ne.s32.totalorder %s544_s11, %s698_s12  ;;  %p704_p12 = scmp.lt.s32.totalorder %s698_s12, %s698_s12 }
  0x7d   :  { %v305_v54 = vadd.f32 %v303_v7, %v281_v51  ;;  %v326_v8 = vadd.f32 %v324_v56, %v316_v27  ;;  %v327_v34 = vmul.f32 %v325_v61, %v871_v43  ;;  %v353_v50 = vmul.f32 %v351_v9, %v833_v28 }
  0x7e   :  { %v346_v14 = vadd.f32 %v344_v55, %v343_v62  ;;  %v354_v15 = vmul.f32 %v352_v36, %v835_v29  ;;  %v370_v16 = vmul.f32 %v369_v13, %v799_v0  ;;  %v371_v20 = vmul.f32 %v369_v13, %v805_v2  ;;  %p705_p13 = por %p704_p12, %p703_p11 }
  0x7f   :  { %v1120_v22 = vmul.f32 %v232_v19, %v979_v18  ;;  %v355_v23 = vadd.f32 %v353_v50, %v345_v6  ;;  %v367_v25 = vadd.f32 %v366_v41, %v364_v52  ;;  %v372_v26 = vstv %s1084_s15 }
  0x80   :  { %v368_v35 = vadd.f32 %v366_v41, %v365_v12  ;;  %v373_v51 = vadd.f32 %v372_v26, %v370_v16  ;;  %v374_v27 = vadd.f32 %v372_v26, %v371_v20  ;;  %v387_v30 = vstv %s1088_s16  ;;  %p706_p0 = pnand %p705_p13, %p699_p10 }
  0x81   :  { %v306_v33 = vadd.f32 %v304_v11, %v282_v10  ;;  %v328_v37 = vmul.f32 %v326_v8, %v879_v46  ;;  %v1125_v49 = vadd.f32 %v327_v34, %v305_v54  ;;  %v1131_v18 = vsub.f32 %v123_v58, %v129_v4 }
  0x82   :  { %v356_v19 = vadd.f32 %v354_v15, %v346_v14  ;;  %v357_v55 = vmul.f32 %v355_v23, %v837_v31  ;;  %v375_v7 = vmul.f32 %v373_v51, %v833_v28  ;;  %v376_v10 = vmul.f32 %v374_v27, %v835_v29 }
  0x83   :  { %v388_v56 = vmul.f32 %v387_v30, %v799_v0  ;;  %v389_v57 = vmul.f32 %v387_v30, %v805_v2  ;;  %v393_v44 = vstv %s1098_s17  ;;  %v411_v58 = vstv %s1100_s18 }
  0x84   :  { %v377_v60 = vadd.f32 %v375_v7, %v367_v25  ;;  %v378_v61 = vadd.f32 %v376_v10, %v368_v35  ;;  %v390_v62 = vstv %s1106_s19  ;;  %v396_v63 = vstv %s1108_s20 }
  0x85   :  { %v394_v1 = vmul.f32 %v393_v44, %v799_v0  ;;  %v395_v6 = vmul.f32 %v393_v44, %v805_v2  ;;  %v412_v9 = vmul.f32 %v411_v58, %v799_v0  ;;  %v413_v36 = vmul.f32 %v411_v58, %v805_v2 }
  0x86   :  { %v358_v52 = vmul.f32 %v356_v19, %v839_v32  ;;  %v379_v11 = vmul.f32 %v377_v60, %v856_v38  ;;  %v414_v12 = vstv %s1115_s21  ;;  %v417_v41 = vstv %s1117_s22 }
  0x87   :  { %v391_v13 = vadd.f32 %v390_v62, %v388_v56  ;;  %v392_v54 = vadd.f32 %v390_v62, %v389_v57  ;;  %v397_v8 = vadd.f32 %v396_v63, %v394_v1  ;;  %v398_v34 = vadd.f32 %v396_v63, %v395_v6 }
  0x88   :  { %v380_v50 = vmul.f32 %v378_v61, %v858_v39  ;;  %v415_v14 = vadd.f32 %v414_v12, %v412_v9  ;;  %v418_v15 = vmul.f32 %v417_v41, %v799_v0  ;;  %v419_v16 = vmul.f32 %v417_v41, %v805_v2 }
  0x89   :  { %v399_v20 = vmul.f32 %v397_v8, %v833_v28  ;;  %v400_v23 = vmul.f32 %v398_v34, %v835_v29  ;;  %v416_v25 = vadd.f32 %v414_v12, %v413_v36  ;;  %v420_v26 = vstv %s1133_s23 }
  0x8a   :  { %v381_v35 = vadd.f32 %v379_v11, %v357_v55  ;;  %v421_v51 = vadd.f32 %v420_v26, %v418_v15  ;;  %v422_v27 = vadd.f32 %v420_v26, %v419_v16  ;;  %v441_v30 = vstv %s1138_s2 }
  0x8b   :  { %v401_v19 = vadd.f32 %v399_v20, %v391_v13  ;;  %v402_v7 = vadd.f32 %v400_v23, %v392_v54  ;;  %v442_v10 = vmul.f32 %v441_v30, %v799_v0  ;;  %v443_v56 = vmul.f32 %v441_v30, %v805_v2 }
  0x8c   :  { %v423_v57 = vmul.f32 %v421_v51, %v833_v28  ;;  %v424_v44 = vmul.f32 %v422_v27, %v835_v29  ;;  %v444_v58 = vstv %s1146_s24  ;;  %v447_v60 = vstv %s1148_s25 }
  0x8d   :  { %v330_v55 = vadd.f32 %v328_v37, %v306_v33  ;;  %v382_v61 = vadd.f32 %v380_v50, %v358_v52  ;;  %v403_v62 = vmul.f32 %v401_v19, %v860_v40  ;;  %v404_v63 = vmul.f32 %v402_v7, %v869_v42 }
  0x8e   :  { %v425_v1 = vadd.f32 %v423_v57, %v415_v14  ;;  %v445_v6 = vadd.f32 %v444_v58, %v442_v10  ;;  %v448_v9 = vmul.f32 %v447_v60, %v799_v0  ;;  %v449_v36 = vmul.f32 %v447_v60, %v805_v2 }
  0x8f   :  { %v426_v11 = vadd.f32 %v424_v44, %v416_v25  ;;  %v446_v33 = vadd.f32 %v444_v58, %v443_v56  ;;  %v450_v37 = vstv %s1158_s26  ;;  %v463_v52 = vstv %s1160_s27 }
  0x90   :  { %v405_v12 = vadd.f32 %v403_v62, %v381_v35  ;;  %v427_v41 = vmul.f32 %v425_v1, %v871_v43  ;;  %v451_v13 = vadd.f32 %v450_v37, %v448_v9  ;;  %v452_v54 = vadd.f32 %v450_v37, %v449_v36 }
  0x91   :  { %v1200_v8 = vmul.f32 %v1125_v49, %v1011_v3  ;;  %v1206_v34 = vsub.f32 %v124_v59, %v130_v53  ;;  %v464_v50 = vmul.f32 %v463_v52, %v799_v0  ;;  %v469_v14 = vstv %s1168_s1 }
  0x92   :  { %v453_v15 = vmul.f32 %v451_v13, %v833_v28  ;;  %v454_v16 = vmul.f32 %v452_v54, %v835_v29  ;;  %v465_v20 = vmul.f32 %v463_v52, %v805_v2  ;;  %v466_v3 = vstv %s1171_s28 }
  0x93   :  { %v332_v49 = vmul.f32 %v330_v55, %v1017_v5  ;;  %v406_v23 = vadd.f32 %v404_v63, %v382_v61  ;;  %v470_v45 = vmul.f32 %v469_v14, %v799_v0  ;;  %v471_v59 = vmul.f32 %v469_v14, %v805_v2 }
  0x94   :  { %v428_v25 = vmul.f32 %v426_v11, %v879_v46  ;;  %v429_v26 = vadd.f32 %v427_v41, %v405_v12  ;;  %v455_v35 = vadd.f32 %v453_v15, %v445_v6  ;;  %v456_v51 = vadd.f32 %v454_v16, %v446_v33 }
  0x95   :  { %v467_v27 = vadd.f32 %v466_v3, %v464_v50  ;;  %v472_v30 = vstv %s1179_s29  ;;  %v487_v5 = vstv %s1183_s3  ;;  %v493_v19 = vstv %s1185_s30 }
  0x96   :  { %v457_v7 = vmul.f32 %v455_v35, %v837_v31  ;;  %v458_v10 = vmul.f32 %v456_v51, %v839_v32  ;;  %v468_v56 = vadd.f32 %v466_v3, %v465_v20  ;;  %v490_v57 = vstv %s1189_s5 }
  0x97   :  { %v473_v44 = vadd.f32 %v472_v30, %v470_v45  ;;  %v474_v58 = vadd.f32 %v472_v30, %v471_v59  ;;  %v488_v60 = vmul.f32 %v487_v5, %v799_v0  ;;  %v489_v55 = vmul.f32 %v487_v5, %v805_v2 }
  0x98   :  { %v494_v61 = vmul.f32 %v493_v19, %v799_v0  ;;  %v495_v62 = vmul.f32 %v493_v19, %v805_v2  ;;  %v496_v63 = vstv %s1194_s6  ;;  %v511_v31 = vstv %s1196_s7 }
  0x99   :  { %v475_v32 = vmul.f32 %v473_v44, %v833_v28  ;;  %v476_v1 = vmul.f32 %v474_v58, %v835_v29  ;;  %v491_v6 = vadd.f32 %v490_v57, %v488_v60  ;;  %v492_v9 = vadd.f32 %v490_v57, %v489_v55 }
  0x9a   :  { %v497_v36 = vadd.f32 %v496_v63, %v494_v61  ;;  %v498_v11 = vadd.f32 %v496_v63, %v495_v62  ;;  %v512_v33 = vmul.f32 %v511_v31, %v799_v0  ;;  %v513_v37 = vmul.f32 %v511_v31, %v805_v2 }
  0x9b   :  { %v477_v52 = vadd.f32 %v475_v32, %v467_v27  ;;  %v478_v12 = vadd.f32 %v476_v1, %v468_v56  ;;  %v514_v41 = vstv %s1217_s8  ;;  %v517_v13 = vstv %s1219_s0 }
  0x9c   :  { %v430_v54 = vadd.f32 %v428_v25, %v406_v23  ;;  %v499_v50 = vmul.f32 %v497_v36, %v833_v28  ;;  %v500_v14 = vmul.f32 %v498_v11, %v835_v29  ;;  %v515_v15 = vadd.f32 %v514_v41, %v512_v33 }
  0x9d   :  { %v479_v16 = vmul.f32 %v477_v52, %v856_v38  ;;  %v480_v20 = vmul.f32 %v478_v12, %v858_v39  ;;  %v518_v3 = vmul.f32 %v517_v13, %v799_v0  ;;  %v519_v45 = vmul.f32 %v517_v13, %v805_v2 }
  0x9e   :  { %v501_v59 = vadd.f32 %v499_v50, %v491_v6  ;;  %v502_v35 = vadd.f32 %v500_v14, %v492_v9  ;;  %v516_v51 = vadd.f32 %v514_v41, %v513_v37  ;;  %v520_v27 = vstv %s1228_s9 }
  0x9f   :  { %v481_v30 = vadd.f32 %v479_v16, %v457_v7  ;;  %v482_v5 = vadd.f32 %v480_v20, %v458_v10  ;;  %v521_v23 = vadd.f32 %v520_v27, %v518_v3  ;;  %v522_v25 = vadd.f32 %v520_v27, %v519_v45 }
  0xa0   :  { %v503_v19 = vmul.f32 %v501_v59, %v860_v40  ;;  %v504_v56 = vmul.f32 %v502_v35, %v869_v42  ;;  %v135_v38 = vmax.f32 %v973_v17, 0.0  ;;  %v136_v39 = vmax.f32 %v984_v21, 0.0 }
  0xa1   :  { %v523_v0 = vmul.f32 %v521_v23, %v833_v28  ;;  %v524_v2 = vmul.f32 %v522_v25, %v835_v29  ;;  %v333_v57 = vadd.f32 %v1200_v8, %v1080_v24  ;;  %v334_v7 = vadd.f32 %v332_v49, %v1120_v22 }
  0xa2   :  { %v431_v10 = vmul.f32 %v429_v26, %v1131_v18  ;;  %v432_v44 = vmul.f32 %v430_v54, %v1206_v34  ;;  %v505_v40 = vadd.f32 %v503_v19, %v481_v30  ;;  %v506_v58 = vadd.f32 %v504_v56, %v482_v5 }
  0xa3   :  { %v525_v42 = vadd.f32 %v523_v0, %v515_v15  ;;  %v526_v60 = vadd.f32 %v524_v2, %v516_v51  ;;  %v435_v17 = vsub.f32 %v129_v4, %v135_v38  ;;  %v436_v28 = vsub.f32 %v130_v53, %v136_v39 }
  0xa4   :  { %v433_v24 = vadd.f32 %v431_v10, %v333_v57  ;;  %v434_v22 = vadd.f32 %v432_v44, %v334_v7 }
  0xa5   :  { %v527_v29 = vmul.f32 %v525_v42, %v871_v43  ;;  %v528_v21 = vmul.f32 %v526_v60, %v879_v46 }
  0xa7   :  { %v529_v8 = vadd.f32 %v527_v29, %v505_v40  ;;  %v530_v18 = vadd.f32 %v528_v21, %v506_v58 }
  0xa9   :  { %v531_v34 = vmul.f32 %v529_v8, %v435_v17  ;;  %v532_v49 = vmul.f32 %v530_v18, %v436_v28 }
  0xab   :  { %v533_v26 = vadd.f32 %v531_v34, %v433_v24  ;;  %v534_v55 = vadd.f32 %v532_v49, %v434_v22 }
  0xad   :  { %535 = vst [vmem:[#allocation11] sm:$0xff] %v533_v26  ;;  %536 = vst [vmem:[#allocation11 + $0x8] sm:$0xff] %v534_v55 }
  0xae   :  { %709 = shalt.err (!%p706_p0)
}
  0xaf   :  { %s710_s15 = scalar_lea.hbm %s1282_s4, 256 }
  0xb0   :  { %p711_p1 = scmp.ne.s32.totalorder %s1282_s4, %s710_s15  ;;  %p714_p2 = scmp.lt.u32.totalorder %s710_s15, %s1282_s4 }
  0xb2   :  { %p716_p3 = pnand %p714_p2, %p711_p1 }
  0xb4   :  { %719 = shalt.err (!%p716_p3)
}
  0xb5   :  { %546 = dma.vmem_to_hbm [thread:$0]  %s544_s11, 256, %s1282_s4, [#allocation4]  }
  0xb6   :  { %728 = dma.done.wait [#allocation4], 256  }
  0xb7   :  { %729 = vsyncadd [#allocation4], 4294967040 }
  0xb8   :  { %550 = vsyncpa [#allocation3], 1 }
  0xb9   :  { %551 = vsyncpa [#allocation10], 1 }
  0xba   :  { %552 = vsyncpa [#allocation4], 1 }
  0xbb   :  { %553 = vsyncpa [#allocation5], 1 }
  0xbc   :  { %554 = vsyncpa [#allocation6], 1 }

</bundles_post_ra>
